<compile_context>
chip_gen: v6e
topology: v6e:2x2x1
jax: 0.10.0
libtpu: 0.0.40
codegen_flags: <defaults>
</compile_context>

<pallas_src>
import math

import jax
import jax.numpy as jnp
from jax.experimental import pallas as pl
from jax.experimental.pallas import tpu as pltpu


# ----------------------------- Pallas kernel -------------------------------

def _make_tcn_kernel(layer_meta):
    """Fused forward over all TemporalBlocks for one batch block.

    Activations are (C, n_lanes) with n_lanes = NB * L (NB batch elements
    laid side by side on the lane axis).
    """

    def kernel(*refs):
        x_ref, t_ref = refs[0], refs[1]
        o_ref = refs[-1]
        pr = refs[2:-1]

        # Per-lane time index within its batch element (hoisted, one copy).
        t_row = t_ref[...]                              # (1, n_lanes) int32

        def causal_shift(y, shift):
            # shifted[:, p] = y[:, p - shift], zero where t < shift (this also
            # kills anything rolled across a batch-element boundary).
            if shift == 0:
                return y
            rolled = pltpu.roll(y, shift=shift, axis=1)
            return jnp.where(t_row >= shift, rolled, 0.0)

        def causal_conv(h_bf16, w_ref, b_ref, dilation):
            # conv = sum_k shift_k(W_k @ h); dead taps were dropped statically.
            n_taps = w_ref.shape[0]
            acc = None
            for j in range(n_taps):
                shift = (n_taps - 1 - j) * dilation
                z = jnp.dot(w_ref[j], h_bf16,
                            preferred_element_type=jnp.float32)
                z = causal_shift(z, shift)
                acc = z if acc is None else acc + z
            return acc + b_ref[...]                     # bias broadcast, f32

        h = x_ref[...]                                  # (C_in0, n_lanes) f32
        idx = 0
        for m in layer_meta:
            d = m["dilation"]
            w1, b1, w2, b2 = pr[idx], pr[idx + 1], pr[idx + 2], pr[idx + 3]
            idx += 4

            hb = h.astype(jnp.bfloat16)                 # one cast per layer
            y1 = jnp.maximum(causal_conv(hb, w1, b1, d), 0.0)
            y2 = jnp.maximum(
                causal_conv(y1.astype(jnp.bfloat16), w2, b2, d), 0.0)

            if m["has_ds"]:                             # 1x1 downsample conv
                wd, bd = pr[idx], pr[idx + 1]
                idx += 2
                res = jnp.dot(wd[...], hb,
                              preferred_element_type=jnp.float32) + bd[...]
            else:
                res = h
            h = jnp.maximum(y2 + res, 0.0)

        o_ref[...] = h.astype(o_ref.dtype)

    return kernel


# ------------------------------- wrapper ------------------------------------

def _const_spec(shape):
    zeros = (0,) * len(shape)
    return pl.BlockSpec(shape, lambda g, _z=zeros: _z)


def _vmem_limit_bytes():
    cap = 64 * 1024 * 1024
    try:
        cap = pltpu.get_tpu_info().vmem_capacity_bytes
    except Exception:
        pass
    return int(min(100 * 1024 * 1024, int(cap * 0.8)))


def tcn_forward(x, params, kernel_size, lane_target=512):
    """Whole TCN. x: (B, C_in0, L) -> (B, num_channels[-1], L)."""
    B, c_in0, L = x.shape
    K = kernel_size

    # Fold several batch elements into the lane axis (lane-dense slabs).
    nb = max(1, min(B, -(-lane_target // L)))
    while B % nb:
        nb -= 1
    nblk = B // nb
    n_lanes = nb * L

    x_blk = (x.reshape(nblk, nb, c_in0, L)
              .transpose(0, 2, 1, 3)
              .reshape(nblk, c_in0, n_lanes))
    t_row = jnp.tile(jnp.arange(L, dtype=jnp.int32), nb).reshape(1, n_lanes)

    layer_meta = []
    flat_args = []
    in_specs = [
        pl.BlockSpec((pl.Squeezed(), c_in0, n_lanes), lambda g: (g, 0, 0)),
        _const_spec((1, n_lanes)),
    ]

    flops = 0
    bytes_accessed = x.size * x.dtype.itemsize + t_row.size * 4

    c_prev = c_in0
    for i, p in enumerate(params):
        d = 2 ** i
        c_out = p["w1"].shape[1]
        has_ds = "wd" in p

        # Statically drop taps whose causal shift >= L (all-zero contribution).
        k_min = 0
        while (K - 1 - k_min) * d >= L:
            k_min += 1
        n_taps = K - k_min

        w1 = p["w1"][k_min:].astype(jnp.bfloat16)   # (n_taps, c_out, c_prev)
        w2 = p["w2"][k_min:].astype(jnp.bfloat16)   # (n_taps, c_out, c_out)
        layer_args = [w1, p["b1"], w2, p["b2"]]
        if has_ds:
            layer_args += [p["wd"].astype(jnp.bfloat16), p["bd"]]
        for a in layer_args:
            flat_args.append(a)
            in_specs.append(_const_spec(a.shape))

        flops += 2 * c_out * n_taps * c_prev * B * L        # conv1
        flops += 2 * c_out * n_taps * c_out * B * L         # conv2
        if has_ds:
            flops += 2 * c_out * c_prev * B * L             # 1x1 downsample
        bytes_accessed += sum(a.size * a.dtype.itemsize for a in layer_args)

        layer_meta.append(dict(dilation=d, has_ds=has_ds))
        c_prev = c_out

    bytes_accessed += B * c_prev * L * 4                    # output

    kernel = _make_tcn_kernel(layer_meta)

    out_blk = pl.pallas_call(
        kernel,
        out_shape=jax.ShapeDtypeStruct((nblk, c_prev, n_lanes), jnp.float32),
        grid=(nblk,),
        in_specs=in_specs,
        out_specs=pl.BlockSpec((pl.Squeezed(), c_prev, n_lanes),
                               lambda g: (g, 0, 0)),
        compiler_params=pltpu.CompilerParams(
            dimension_semantics=("parallel",),
            vmem_limit_bytes=_vmem_limit_bytes()),
        cost_estimate=pl.CostEstimate(
            flops=int(flops), transcendentals=0,
            bytes_accessed=int(bytes_accessed)),
    )(x_blk, t_row, *flat_args)

    return (out_blk.reshape(nblk, c_prev, nb, L)
                   .transpose(0, 2, 1, 3)
                   .reshape(B, c_prev, L))


# ------------------------- parameter construction --------------------------

def init_tcn_params(key, num_inputs, num_channels, kernel_size):
    params = []
    for i, c_out in enumerate(num_channels):
        c_in = num_inputs if i == 0 else num_channels[i - 1]
        key, k0, k1, k2, k3, k4, k5 = jax.random.split(key, 7)
        bound1 = 1.0 / math.sqrt(c_in * kernel_size)
        bound2 = 1.0 / math.sqrt(c_out * kernel_size)
        p = {
            # stored as (K, C_out, C_in): per-tap (C_out, C_in) matmul weight
            "w1": 0.01 * jax.random.normal(k0, (kernel_size, c_out, c_in),
                                           jnp.float32),
            "b1": bound1 * jax.random.uniform(k1, (c_out, 1), jnp.float32,
                                              -1.0, 1.0),
            "w2": 0.01 * jax.random.normal(k2, (kernel_size, c_out, c_out),
                                           jnp.float32),
            "b2": bound2 * jax.random.uniform(k3, (c_out, 1), jnp.float32,
                                              -1.0, 1.0),
        }
        if c_in != c_out:  # 1x1 downsample conv
            p["wd"] = 0.01 * jax.random.normal(k4, (c_out, c_in), jnp.float32)
            p["bd"] = (1.0 / math.sqrt(c_in)) * jax.random.uniform(
                k5, (c_out, 1), jnp.float32, -1.0, 1.0)
        params.append(p)
    return params


# ------------------------- pure-JAX reference ------------------------------

def _ref_causal_conv(x, w, b, dilation):
    K = w.shape[0]
    pad = (K - 1) * dilation
    y = jax.lax.conv_general_dilated(
        x, jnp.transpose(w, (1, 2, 0)),          # (C_out, C_in, K)
        window_strides=(1,), padding=[(pad, 0)],
        rhs_dilation=(dilation,),
        dimension_numbers=("NCH", "OIH", "NCH"))
    return y + b[None, :, :]


def ref_tcn(x, params, kernel_size):
    for i, p in enumerate(params):
        d = 2 ** i
        y1 = jax.nn.relu(_ref_causal_conv(x, p["w1"], p["b1"], d))
        y2 = jax.nn.relu(_ref_causal_conv(y1, p["w2"], p["b2"], d))
        if "wd" in p:
            res = jnp.einsum("oi,bil->bol", p["wd"], x) + p["bd"][None]
        else:
            res = x
        x = jax.nn.relu(y2 + res)
    return x


# --------------------------------- main -------------------------------------

if __name__ == "__main__":
    B, num_inputs, L = 2, 4, 16
    num_channels = [8, 16]
    kernel_size = 2

    key = jax.random.PRNGKey(0)
    kx, kp = jax.random.split(key)
    x = jax.random.normal(kx, (B, num_inputs, L), jnp.float32)
    params = init_tcn_params(kp, num_inputs, num_channels, kernel_size)

    out = tcn_forward(x, params, kernel_size)
    out = jax.block_until_ready(out)

    ref = jax.block_until_ready(ref_tcn(x, params, kernel_size))
    assert out.shape == (B, num_channels[-1], L)
    # Kernel matmuls run in bf16 (f32 accumulate); reference is pure f32.
    assert jnp.allclose(out, ref, atol=1e-2, rtol=1e-2), (
        float(jnp.max(jnp.abs(out - ref))))

    print("KERNEL_OK")
</pallas_src>

<mosaic_0001>
module attributes {stable_mosaic.version = 11 : i64} {
  func.func @kernel(%arg0: i32, %arg1: memref<1x4x32xf32, #tpu.memory_space<vmem>>, %arg2: memref<1x32xi32, #tpu.memory_space<vmem>>, %arg3: memref<2x8x4xbf16, #tpu.memory_space<vmem>>, %arg4: memref<8x1xf32, #tpu.memory_space<vmem>>, %arg5: memref<2x8x8xbf16, #tpu.memory_space<vmem>>, %arg6: memref<8x1xf32, #tpu.memory_space<vmem>>, %arg7: memref<8x4xbf16, #tpu.memory_space<vmem>>, %arg8: memref<8x1xf32, #tpu.memory_space<vmem>>, %arg9: memref<2x16x8xbf16, #tpu.memory_space<vmem>>, %arg10: memref<16x1xf32, #tpu.memory_space<vmem>>, %arg11: memref<2x16x16xbf16, #tpu.memory_space<vmem>>, %arg12: memref<16x1xf32, #tpu.memory_space<vmem>>, %arg13: memref<16x8xbf16, #tpu.memory_space<vmem>>, %arg14: memref<16x1xf32, #tpu.memory_space<vmem>>, %arg15: memref<1x16x32xf32, #tpu.memory_space<vmem>>) attributes {dimension_semantics = [#tpu.dimension_semantics<parallel>], iteration_bounds = array<i64: 1>, scalar_prefetch = 0 : i64, scratch_operands = 0 : i64, tpu.core_type = #tpu.core_type<tc>, window_params = [{transform_indices = @transform_0, window_bounds = array<i64: 1, 4, 32>}, {pipeline_mode = #tpu.pipeline_mode<synchronous>, transform_indices = @transform_1, window_bounds = array<i64: 1, 32>}, {pipeline_mode = #tpu.pipeline_mode<synchronous>, transform_indices = @transform_2, window_bounds = array<i64: 2, 8, 4>}, {pipeline_mode = #tpu.pipeline_mode<synchronous>, transform_indices = @transform_3, window_bounds = array<i64: 8, 1>}, {pipeline_mode = #tpu.pipeline_mode<synchronous>, transform_indices = @transform_4, window_bounds = array<i64: 2, 8, 8>}, {pipeline_mode = #tpu.pipeline_mode<synchronous>, transform_indices = @transform_5, window_bounds = array<i64: 8, 1>}, {pipeline_mode = #tpu.pipeline_mode<synchronous>, transform_indices = @transform_6, window_bounds = array<i64: 8, 4>}, {pipeline_mode = #tpu.pipeline_mode<synchronous>, transform_indices = @transform_7, window_bounds = array<i64: 8, 1>}, {pipeline_mode = #tpu.pipeline_mode<synchronous>, transform_indices = @transform_8, window_bounds = array<i64: 2, 16, 8>}, {pipeline_mode = #tpu.pipeline_mode<synchronous>, transform_indices = @transform_9, window_bounds = array<i64: 16, 1>}, {pipeline_mode = #tpu.pipeline_mode<synchronous>, transform_indices = @transform_10, window_bounds = array<i64: 2, 16, 16>}, {pipeline_mode = #tpu.pipeline_mode<synchronous>, transform_indices = @transform_11, window_bounds = array<i64: 16, 1>}, {pipeline_mode = #tpu.pipeline_mode<synchronous>, transform_indices = @transform_12, window_bounds = array<i64: 16, 8>}, {pipeline_mode = #tpu.pipeline_mode<synchronous>, transform_indices = @transform_13, window_bounds = array<i64: 16, 1>}, {transform_indices = @transform_14, window_bounds = array<i64: 1, 16, 32>}]} {
    %c0 = arith.constant 0 : index
    %c0_0 = arith.constant 0 : index
    %0 = vector.load %arg2[%c0, %c0_0] : memref<1x32xi32, #tpu.memory_space<vmem>>, vector<1x32xi32>
    %c0_1 = arith.constant 0 : index
    %c0_2 = arith.constant 0 : index
    %c0_3 = arith.constant 0 : index
    %1 = vector.load %arg1[%c0_1, %c0_2, %c0_3] : memref<1x4x32xf32, #tpu.memory_space<vmem>>, vector<1x4x32xf32>
    %2 = vector.shape_cast %1 : vector<1x4x32xf32> to vector<4x32xf32>
    %3 = arith.truncf %2 : vector<4x32xf32> to vector<4x32xbf16>
    %c0_4 = arith.constant 0 : index
    %c0_5 = arith.constant 0 : index
    %c0_6 = arith.constant 0 : index
    %4 = vector.load %arg3[%c0_4, %c0_5, %c0_6] : memref<2x8x4xbf16, #tpu.memory_space<vmem>>, vector<1x8x4xbf16>
    %5 = vector.shape_cast %4 : vector<1x8x4xbf16> to vector<8x4xbf16>
    %cst = arith.constant dense<0.000000e+00> : vector<8x32xf32>
    %6 = tpu.matmul %5, %3, %cst {dimension_numbers = #tpu.dot_dimension_numbers<[1], [0], [0], [1], [0, 0, 1, 1], [], []>} : vector<8x4xbf16>, vector<4x32xbf16>, vector<8x32xf32> -> vector<8x32xf32>
    %c1_i32 = arith.constant 1 : i32
    %7 = tpu.dynamic_rotate %6 by %c1_i32 dim 1 : vector<8x32xf32>, i32 -> vector<8x32xf32>
    %c1_i32_7 = arith.constant 1 : i32
    %8 = vector.broadcast %c1_i32_7 : i32 to vector<1x32xi32>
    %9 = arith.cmpi sge, %0, %8 : vector<1x32xi32>
    %cst_8 = arith.constant 0.000000e+00 : f32
    %10 = vector.shape_cast %9 : vector<1x32xi1> to vector<1x32xi1>
    %11 = vector.broadcast %10 : vector<1x32xi1> to vector<8x32xi1>
    %12 = vector.broadcast %cst_8 : f32 to vector<8x32xf32>
    %13 = arith.select %11, %7, %12 : vector<8x32xi1>, vector<8x32xf32>
    %c1 = arith.constant 1 : index
    %c0_9 = arith.constant 0 : index
    %c0_10 = arith.constant 0 : index
    %14 = vector.load %arg3[%c1, %c0_9, %c0_10] : memref<2x8x4xbf16, #tpu.memory_space<vmem>>, vector<1x8x4xbf16>
    %15 = vector.shape_cast %14 : vector<1x8x4xbf16> to vector<8x4xbf16>
    %cst_11 = arith.constant dense<0.000000e+00> : vector<8x32xf32>
    %16 = tpu.matmul %15, %3, %cst_11 {dimension_numbers = #tpu.dot_dimension_numbers<[1], [0], [0], [1], [0, 0, 1, 1], [], []>} : vector<8x4xbf16>, vector<4x32xbf16>, vector<8x32xf32> -> vector<8x32xf32>
    %17 = arith.addf %13, %16 : vector<8x32xf32>
    %c0_12 = arith.constant 0 : index
    %c0_13 = arith.constant 0 : index
    %18 = vector.load %arg4[%c0_12, %c0_13] : memref<8x1xf32, #tpu.memory_space<vmem>>, vector<8x1xf32>
    %19 = vector.broadcast %18 : vector<8x1xf32> to vector<8x32xf32>
    %20 = arith.addf %17, %19 : vector<8x32xf32>
    %cst_14 = arith.constant 0.000000e+00 : f32
    %21 = vector.broadcast %cst_14 : f32 to vector<8x32xf32>
    %22 = arith.maximumf %20, %21 : vector<8x32xf32>
    %23 = arith.truncf %22 : vector<8x32xf32> to vector<8x32xbf16>
    %c0_15 = arith.constant 0 : index
    %c0_16 = arith.constant 0 : index
    %c0_17 = arith.constant 0 : index
    %24 = vector.load %arg5[%c0_15, %c0_16, %c0_17] : memref<2x8x8xbf16, #tpu.memory_space<vmem>>, vector<1x8x8xbf16>
    %25 = vector.shape_cast %24 : vector<1x8x8xbf16> to vector<8x8xbf16>
    %cst_18 = arith.constant dense<0.000000e+00> : vector<8x32xf32>
    %26 = tpu.matmul %25, %23, %cst_18 {dimension_numbers = #tpu.dot_dimension_numbers<[1], [0], [0], [1], [0, 0, 1, 1], [], []>} : vector<8x8xbf16>, vector<8x32xbf16>, vector<8x32xf32> -> vector<8x32xf32>
    %c1_i32_19 = arith.constant 1 : i32
    %27 = tpu.dynamic_rotate %26 by %c1_i32_19 dim 1 : vector<8x32xf32>, i32 -> vector<8x32xf32>
    %c1_i32_20 = arith.constant 1 : i32
    %28 = vector.broadcast %c1_i32_20 : i32 to vector<1x32xi32>
    %29 = arith.cmpi sge, %0, %28 : vector<1x32xi32>
    %cst_21 = arith.constant 0.000000e+00 : f32
    %30 = vector.shape_cast %29 : vector<1x32xi1> to vector<1x32xi1>
    %31 = vector.broadcast %30 : vector<1x32xi1> to vector<8x32xi1>
    %32 = vector.broadcast %cst_21 : f32 to vector<8x32xf32>
    %33 = arith.select %31, %27, %32 : vector<8x32xi1>, vector<8x32xf32>
    %c1_22 = arith.constant 1 : index
    %c0_23 = arith.constant 0 : index
    %c0_24 = arith.constant 0 : index
    %34 = vector.load %arg5[%c1_22, %c0_23, %c0_24] : memref<2x8x8xbf16, #tpu.memory_space<vmem>>, vector<1x8x8xbf16>
    %35 = vector.shape_cast %34 : vector<1x8x8xbf16> to vector<8x8xbf16>
    %cst_25 = arith.constant dense<0.000000e+00> : vector<8x32xf32>
    %36 = tpu.matmul %35, %23, %cst_25 {dimension_numbers = #tpu.dot_dimension_numbers<[1], [0], [0], [1], [0, 0, 1, 1], [], []>} : vector<8x8xbf16>, vector<8x32xbf16>, vector<8x32xf32> -> vector<8x32xf32>
    %37 = arith.addf %33, %36 : vector<8x32xf32>
    %c0_26 = arith.constant 0 : index
    %c0_27 = arith.constant 0 : index
    %38 = vector.load %arg6[%c0_26, %c0_27] : memref<8x1xf32, #tpu.memory_space<vmem>>, vector<8x1xf32>
    %39 = vector.broadcast %38 : vector<8x1xf32> to vector<8x32xf32>
    %40 = arith.addf %37, %39 : vector<8x32xf32>
    %cst_28 = arith.constant 0.000000e+00 : f32
    %41 = vector.broadcast %cst_28 : f32 to vector<8x32xf32>
    %42 = arith.maximumf %40, %41 : vector<8x32xf32>
    %c0_29 = arith.constant 0 : index
    %c0_30 = arith.constant 0 : index
    %43 = vector.load %arg7[%c0_29, %c0_30] : memref<8x4xbf16, #tpu.memory_space<vmem>>, vector<8x4xbf16>
    %cst_31 = arith.constant dense<0.000000e+00> : vector<8x32xf32>
    %44 = tpu.matmul %43, %3, %cst_31 {dimension_numbers = #tpu.dot_dimension_numbers<[1], [0], [0], [1], [0, 0, 1, 1], [], []>} : vector<8x4xbf16>, vector<4x32xbf16>, vector<8x32xf32> -> vector<8x32xf32>
    %c0_32 = arith.constant 0 : index
    %c0_33 = arith.constant 0 : index
    %45 = vector.load %arg8[%c0_32, %c0_33] : memref<8x1xf32, #tpu.memory_space<vmem>>, vector<8x1xf32>
    %46 = vector.broadcast %45 : vector<8x1xf32> to vector<8x32xf32>
    %47 = arith.addf %44, %46 : vector<8x32xf32>
    %48 = arith.addf %42, %47 : vector<8x32xf32>
    %cst_34 = arith.constant 0.000000e+00 : f32
    %49 = vector.broadcast %cst_34 : f32 to vector<8x32xf32>
    %50 = arith.maximumf %48, %49 : vector<8x32xf32>
    %51 = arith.truncf %50 : vector<8x32xf32> to vector<8x32xbf16>
    %c0_35 = arith.constant 0 : index
    %c0_36 = arith.constant 0 : index
    %c0_37 = arith.constant 0 : index
    %52 = vector.load %arg9[%c0_35, %c0_36, %c0_37] : memref<2x16x8xbf16, #tpu.memory_space<vmem>>, vector<1x16x8xbf16>
    %53 = vector.shape_cast %52 : vector<1x16x8xbf16> to vector<16x8xbf16>
    %cst_38 = arith.constant dense<0.000000e+00> : vector<16x32xf32>
    %54 = tpu.matmul %53, %51, %cst_38 {dimension_numbers = #tpu.dot_dimension_numbers<[1], [0], [0], [1], [0, 0, 1, 1], [], []>} : vector<16x8xbf16>, vector<8x32xbf16>, vector<16x32xf32> -> vector<16x32xf32>
    %c2_i32 = arith.constant 2 : i32
    %55 = tpu.dynamic_rotate %54 by %c2_i32 dim 1 : vector<16x32xf32>, i32 -> vector<16x32xf32>
    %c2_i32_39 = arith.constant 2 : i32
    %56 = vector.broadcast %c2_i32_39 : i32 to vector<1x32xi32>
    %57 = arith.cmpi sge, %0, %56 : vector<1x32xi32>
    %cst_40 = arith.constant 0.000000e+00 : f32
    %58 = vector.shape_cast %57 : vector<1x32xi1> to vector<1x32xi1>
    %59 = vector.broadcast %58 : vector<1x32xi1> to vector<16x32xi1>
    %60 = vector.broadcast %cst_40 : f32 to vector<16x32xf32>
    %61 = arith.select %59, %55, %60 : vector<16x32xi1>, vector<16x32xf32>
    %c1_41 = arith.constant 1 : index
    %c0_42 = arith.constant 0 : index
    %c0_43 = arith.constant 0 : index
    %62 = vector.load %arg9[%c1_41, %c0_42, %c0_43] : memref<2x16x8xbf16, #tpu.memory_space<vmem>>, vector<1x16x8xbf16>
    %63 = vector.shape_cast %62 : vector<1x16x8xbf16> to vector<16x8xbf16>
    %cst_44 = arith.constant dense<0.000000e+00> : vector<16x32xf32>
    %64 = tpu.matmul %63, %51, %cst_44 {dimension_numbers = #tpu.dot_dimension_numbers<[1], [0], [0], [1], [0, 0, 1, 1], [], []>} : vector<16x8xbf16>, vector<8x32xbf16>, vector<16x32xf32> -> vector<16x32xf32>
    %65 = arith.addf %61, %64 : vector<16x32xf32>
    %c0_45 = arith.constant 0 : index
    %c0_46 = arith.constant 0 : index
    %66 = vector.load %arg10[%c0_45, %c0_46] : memref<16x1xf32, #tpu.memory_space<vmem>>, vector<16x1xf32>
    %67 = vector.broadcast %66 : vector<16x1xf32> to vector<16x32xf32>
    %68 = arith.addf %65, %67 : vector<16x32xf32>
    %cst_47 = arith.constant 0.000000e+00 : f32
    %69 = vector.broadcast %cst_47 : f32 to vector<16x32xf32>
    %70 = arith.maximumf %68, %69 : vector<16x32xf32>
    %71 = arith.truncf %70 : vector<16x32xf32> to vector<16x32xbf16>
    %c0_48 = arith.constant 0 : index
    %c0_49 = arith.constant 0 : index
    %c0_50 = arith.constant 0 : index
    %72 = vector.load %arg11[%c0_48, %c0_49, %c0_50] : memref<2x16x16xbf16, #tpu.memory_space<vmem>>, vector<1x16x16xbf16>
    %73 = vector.shape_cast %72 : vector<1x16x16xbf16> to vector<16x16xbf16>
    %cst_51 = arith.constant dense<0.000000e+00> : vector<16x32xf32>
    %74 = tpu.matmul %73, %71, %cst_51 {dimension_numbers = #tpu.dot_dimension_numbers<[1], [0], [0], [1], [0, 0, 1, 1], [], []>} : vector<16x16xbf16>, vector<16x32xbf16>, vector<16x32xf32> -> vector<16x32xf32>
    %c2_i32_52 = arith.constant 2 : i32
    %75 = tpu.dynamic_rotate %74 by %c2_i32_52 dim 1 : vector<16x32xf32>, i32 -> vector<16x32xf32>
    %c2_i32_53 = arith.constant 2 : i32
    %76 = vector.broadcast %c2_i32_53 : i32 to vector<1x32xi32>
    %77 = arith.cmpi sge, %0, %76 : vector<1x32xi32>
    %cst_54 = arith.constant 0.000000e+00 : f32
    %78 = vector.shape_cast %77 : vector<1x32xi1> to vector<1x32xi1>
    %79 = vector.broadcast %78 : vector<1x32xi1> to vector<16x32xi1>
    %80 = vector.broadcast %cst_54 : f32 to vector<16x32xf32>
    %81 = arith.select %79, %75, %80 : vector<16x32xi1>, vector<16x32xf32>
    %c1_55 = arith.constant 1 : index
    %c0_56 = arith.constant 0 : index
    %c0_57 = arith.constant 0 : index
    %82 = vector.load %arg11[%c1_55, %c0_56, %c0_57] : memref<2x16x16xbf16, #tpu.memory_space<vmem>>, vector<1x16x16xbf16>
    %83 = vector.shape_cast %82 : vector<1x16x16xbf16> to vector<16x16xbf16>
    %cst_58 = arith.constant dense<0.000000e+00> : vector<16x32xf32>
    %84 = tpu.matmul %83, %71, %cst_58 {dimension_numbers = #tpu.dot_dimension_numbers<[1], [0], [0], [1], [0, 0, 1, 1], [], []>} : vector<16x16xbf16>, vector<16x32xbf16>, vector<16x32xf32> -> vector<16x32xf32>
    %85 = arith.addf %81, %84 : vector<16x32xf32>
    %c0_59 = arith.constant 0 : index
    %c0_60 = arith.constant 0 : index
    %86 = vector.load %arg12[%c0_59, %c0_60] : memref<16x1xf32, #tpu.memory_space<vmem>>, vector<16x1xf32>
    %87 = vector.broadcast %86 : vector<16x1xf32> to vector<16x32xf32>
    %88 = arith.addf %85, %87 : vector<16x32xf32>
    %cst_61 = arith.constant 0.000000e+00 : f32
    %89 = vector.broadcast %cst_61 : f32 to vector<16x32xf32>
    %90 = arith.maximumf %88, %89 : vector<16x32xf32>
    %c0_62 = arith.constant 0 : index
    %c0_63 = arith.constant 0 : index
    %91 = vector.load %arg13[%c0_62, %c0_63] : memref<16x8xbf16, #tpu.memory_space<vmem>>, vector<16x8xbf16>
    %cst_64 = arith.constant dense<0.000000e+00> : vector<16x32xf32>
    %92 = tpu.matmul %91, %51, %cst_64 {dimension_numbers = #tpu.dot_dimension_numbers<[1], [0], [0], [1], [0, 0, 1, 1], [], []>} : vector<16x8xbf16>, vector<8x32xbf16>, vector<16x32xf32> -> vector<16x32xf32>
    %c0_65 = arith.constant 0 : index
    %c0_66 = arith.constant 0 : index
    %93 = vector.load %arg14[%c0_65, %c0_66] : memref<16x1xf32, #tpu.memory_space<vmem>>, vector<16x1xf32>
    %94 = vector.broadcast %93 : vector<16x1xf32> to vector<16x32xf32>
    %95 = arith.addf %92, %94 : vector<16x32xf32>
    %96 = arith.addf %90, %95 : vector<16x32xf32>
    %cst_67 = arith.constant 0.000000e+00 : f32
    %97 = vector.broadcast %cst_67 : f32 to vector<16x32xf32>
    %98 = arith.maximumf %96, %97 : vector<16x32xf32>
    %c0_68 = arith.constant 0 : index
    %c0_69 = arith.constant 0 : index
    %c0_70 = arith.constant 0 : index
    %99 = vector.load %arg15[%c0_68, %c0_69, %c0_70] : memref<1x16x32xf32, #tpu.memory_space<vmem>>, vector<1x16x32xf32>
    %100 = vector.shape_cast %99 : vector<1x16x32xf32> to vector<16x32xf32>
    %101 = vector.shape_cast %98 : vector<16x32xf32> to vector<1x16x32xf32>
    tpu.vector_store %arg15[%c0_68, %c0_69, %c0_70], %101 {strides = array<i32>} : memref<1x16x32xf32, #tpu.memory_space<vmem>>, vector<1x16x32xf32>,
    return
  }
  func.func @transform_0(%arg0: i32) -> (i32, i32, i32) {
    %c0_i32 = arith.constant 0 : i32
    %c0_i32_0 = arith.constant 0 : i32
    %c0_i32_1 = arith.constant 0 : i32
    return %arg0, %c0_i32, %c0_i32_0 : i32, i32, i32
  }
  func.func @transform_1(%arg0: i32) -> (i32, i32) {
    %c0_i32 = arith.constant 0 : i32
    %c0_i32_0 = arith.constant 0 : i32
    %c0_i32_1 = arith.constant 0 : i32
    return %c0_i32, %c0_i32_0 : i32, i32
  }
  func.func @transform_2(%arg0: i32) -> (i32, i32, i32) {
    %c0_i32 = arith.constant 0 : i32
    %c0_i32_0 = arith.constant 0 : i32
    %c0_i32_1 = arith.constant 0 : i32
    %c0_i32_2 = arith.constant 0 : i32
    return %c0_i32, %c0_i32_0, %c0_i32_1 : i32, i32, i32
  }
  func.func @transform_3(%arg0: i32) -> (i32, i32) {
    %c0_i32 = arith.constant 0 : i32
    %c0_i32_0 = arith.constant 0 : i32
    %c0_i32_1 = arith.constant 0 : i32
    return %c0_i32, %c0_i32_0 : i32, i32
  }
  func.func @transform_4(%arg0: i32) -> (i32, i32, i32) {
    %c0_i32 = arith.constant 0 : i32
    %c0_i32_0 = arith.constant 0 : i32
    %c0_i32_1 = arith.constant 0 : i32
    %c0_i32_2 = arith.constant 0 : i32
    return %c0_i32, %c0_i32_0, %c0_i32_1 : i32, i32, i32
  }
  func.func @transform_5(%arg0: i32) -> (i32, i32) {
    %c0_i32 = arith.constant 0 : i32
    %c0_i32_0 = arith.constant 0 : i32
    %c0_i32_1 = arith.constant 0 : i32
    return %c0_i32, %c0_i32_0 : i32, i32
  }
  func.func @transform_6(%arg0: i32) -> (i32, i32) {
    %c0_i32 = arith.constant 0 : i32
    %c0_i32_0 = arith.constant 0 : i32
    %c0_i32_1 = arith.constant 0 : i32
    return %c0_i32, %c0_i32_0 : i32, i32
  }
  func.func @transform_7(%arg0: i32) -> (i32, i32) {
    %c0_i32 = arith.constant 0 : i32
    %c0_i32_0 = arith.constant 0 : i32
    %c0_i32_1 = arith.constant 0 : i32
    return %c0_i32, %c0_i32_0 : i32, i32
  }
  func.func @transform_8(%arg0: i32) -> (i32, i32, i32) {
    %c0_i32 = arith.constant 0 : i32
    %c0_i32_0 = arith.constant 0 : i32
    %c0_i32_1 = arith.constant 0 : i32
    %c0_i32_2 = arith.constant 0 : i32
    return %c0_i32, %c0_i32_0, %c0_i32_1 : i32, i32, i32
  }
  func.func @transform_9(%arg0: i32) -> (i32, i32) {
    %c0_i32 = arith.constant 0 : i32
    %c0_i32_0 = arith.constant 0 : i32
    %c0_i32_1 = arith.constant 0 : i32
    return %c0_i32, %c0_i32_0 : i32, i32
  }
  func.func @transform_10(%arg0: i32) -> (i32, i32, i32) {
    %c0_i32 = arith.constant 0 : i32
    %c0_i32_0 = arith.constant 0 : i32
    %c0_i32_1 = arith.constant 0 : i32
    %c0_i32_2 = arith.constant 0 : i32
    return %c0_i32, %c0_i32_0, %c0_i32_1 : i32, i32, i32
  }
  func.func @transform_11(%arg0: i32) -> (i32, i32) {
    %c0_i32 = arith.constant 0 : i32
    %c0_i32_0 = arith.constant 0 : i32
    %c0_i32_1 = arith.constant 0 : i32
    return %c0_i32, %c0_i32_0 : i32, i32
  }
  func.func @transform_12(%arg0: i32) -> (i32, i32) {
    %c0_i32 = arith.constant 0 : i32
    %c0_i32_0 = arith.constant 0 : i32
    %c0_i32_1 = arith.constant 0 : i32
    return %c0_i32, %c0_i32_0 : i32, i32
  }
  func.func @transform_13(%arg0: i32) -> (i32, i32) {
    %c0_i32 = arith.constant 0 : i32
    %c0_i32_0 = arith.constant 0 : i32
    %c0_i32_1 = arith.constant 0 : i32
    return %c0_i32, %c0_i32_0 : i32, i32
  }
  func.func @transform_14(%arg0: i32) -> (i32, i32, i32) {
    %c0_i32 = arith.constant 0 : i32
    %c0_i32_0 = arith.constant 0 : i32
    %c0_i32_1 = arith.constant 0 : i32
    return %arg0, %c0_i32, %c0_i32_0 : i32, i32, i32
  }
}

</mosaic_0001>

<bundles_post_ra>
// kernel: tpu_custom_call.1
= control target key start
LH: loop header
LB: loop body
LE: loop exit
PB: predicated region body
PF: predicated region fallthrough
CT: control target
= control target key end

     0   :  { %vm57_vm0 = vcmask 1041408   ;;  %v865_v1 = vmov 0.0   ;;  %vm866_vm1 = vmmov 0   ;;  %vm53_vm2 = vcmask 31744   ;;  %s1113_s0 = inlined_call_operand.vmem [shape: f32[1,4,32], index: 0, kind: input, shape index: {}]   ;;  %s1114_s1 = inlined_call_operand.vmem [shape: s32[1,32], index: 1, kind: input, shape index: {}]   ;;  %s1115_s2 = inlined_call_operand.vmem [shape: bf16[2,8,4], index: 2, kind: input, shape index: {}]   ;;  %s1116_s3 = inlined_call_operand.vmem [shape: f32[8,1], index: 3, kind: input, shape index: {}]   ;;  %s1117_s4 = inlined_call_operand.vmem [shape: bf16[2,8,8], index: 4, kind: input, shape index: {}]   ;;  %s1118_s5 = inlined_call_operand.vmem [shape: f32[8,1], index: 5, kind: input, shape index: {}]   ;;  %s1119_s6 = inlined_call_operand.vmem [shape: bf16[8,4], index: 6, kind: input, shape index: {}]   ;;  %s1120_s7 = inlined_call_operand.vmem [shape: f32[8,1], index: 7, kind: input, shape index: {}]   ;;  %s1121_s8 = inlined_call_operand.vmem [shape: bf16[2,16,8], index: 8, kind: input, shape index: {}]   ;;  %s1122_s9 = inlined_call_operand.vmem [shape: f32[16,1], index: 9, kind: input, shape index: {}]   ;;  %s1123_s10 = inlined_call_operand.vmem [shape: bf16[2,16,16], index: 10, kind: input, shape index: {}]   ;;  %s1124_s11 = inlined_call_operand.vmem [shape: f32[16,1], index: 11, kind: input, shape index: {}]   ;;  %s1125_s12 = inlined_call_operand.vmem [shape: bf16[16,8], index: 12, kind: input, shape index: {}]   ;;  %s1126_s13 = inlined_call_operand.vmem [shape: f32[16,1], index: 13, kind: input, shape index: {}]   ;;  %s1127_s14 = inlined_call_operand.hbm [shape: f32[1,16,32], index: 14, kind: output, shape index: {}]  }
   0x1   :  { %v50_v0 = vld [vmem:[%s1113_s0] sm:$0xf]  ;;  %767 = vmatprep.subr.bf16.mxu0 %v865_v1  ;;  %769 = vmatprep.mubr.msk.bf16.mxu0 %vm866_vm1, %v865_v1 }
   0x2   :  { %v51_v2 = vpack.c.bf16 %v50_v0, %v50_v0  ;;  %v52_v3 = vld [vmem:[%s1115_s2] sm:$0xf]  ;;  %773 = vmatprep.subr.bf16.mxu1 %v865_v1  ;;  %775 = vmatprep.mubr.msk.bf16.mxu1 %vm866_vm1, %v865_v1 }
   0x4   :  { %v59_v4 = vsel %vm57_vm0, %v51_v2, 0 }
   0x5   :  { %768 = vmatpush3.bf16.msra.mxu0 %v59_v4  ;;  %774 = vmatpush3.bf16.msra.mxu1 %v59_v4 }
   0x6   :  { %779 = vmatprep.subr.bf16.mxu0 %v865_v1  ;;  %785 = vmatprep.subr.bf16.mxu1 %v865_v1 }
   0x7   :  { %19 = vsyncpa [#allocation3], 0  ;;  %v727_v5 = vld [vmem:[%s1115_s2 + $0x4] sm:$0xf]  ;;  %v867_v7 = vmov 0   ;;  %s868_s20 = smov 32   ;;  %v110_v20 = vlaneseq }
   0x8   :  { %770 = vmatmul.mubr.msk.bf16.vlgmr.msra.gmra.mxu0 %vm53_vm2, %v52_v3  ;;  %v166_v6 = vld [vmem:[%s1116_s3] sm:$0xff]  ;;  %776 = vmatmul.mubr.msk.bf16.vlgmr.msra.gmra.mxu1 %vm53_vm2, %v727_v5  ;;  %vm101_vm3 = vcmask 1047808   ;;  %s869_s2 = smov 97   ;;  %vm180_vm6 = vcmask 1043456   ;;  %vm176_vm7 = vcmask 64512   ;;  %v839_v5 = vld [vmem:[%s1121_s8 + $0x8] sm:$0xff]  }
   0x9   :  { %781 = vmatprep.mubr.msk.bf16.mxu0 %vm866_vm1, %v865_v1  ;;  %836 = vset.pattern.permute.xlu1 %v867_v7  ;;  %v985_v21 = vld [vmem:[%s1114_s1] sm:$0x1]  ;;  %v987_v22 = vshrl.u32 %v110_v20, 7  ;;  %v730_v35 = vld [vmem:[%s1117_s4 + $0x4] sm:$0xf]  ;;  %s870_s17 = smov 98  }
   0xa   :  { %169 = vperm.xlu1 %836, %v166_v6   ;;  %787 = vmatprep.mubr.msk.bf16.mxu1 %vm866_vm1, %v865_v1  ;;  %vm108_vm4 = vcmp.ge.s32.totalorder %v985_v21, 1  ;;  %v175_v34 = vld [vmem:[%s1117_s4] sm:$0xf]  ;;  %vm408_vm8 = vcmp.ge.s32.totalorder %v985_v21, 2  ;;  %vm503_vm10 = vcmask 130048   ;;  %vm707_vm11 = vcmask 261120  }
   0xb   :  { %837 = vset.pattern.permute.xlu0 %v867_v7  ;;  %v112_v23 = vsub.s32 0, %v987_v22  ;;  %v109_v24 = vsel %vm108_vm4, 1, %v867_v7  ;;  %v289_v36 = vld [vmem:[%s1119_s6] sm:$0xf] }
   0xc   :  { %v281_v39 = vld [vmem:[%s1118_s5] sm:$0xff] }
   0xd   :  { %v113_v26 = vrot.slane %v109_v24, %v112_v23  ;;  %v290_v54 = vld [vmem:[%s1120_s7] sm:$0xff] }
   0xf   :  { %vm114_vm5 = vcmp.eq.s32.totalorder %v113_v26, 1 }
  0x85   :  { %v170_v25 = vpop.permute.xlu1 %169 }
  0xc8   :  { %v95_v8 = vpop.f32.mrf.mxu0  ;;  %v159_v14 = vpop.f32.mrf.mxu1 }
  0xc9   :  { %102 = vrot.lane.b32.xlu0 %v95_v8, %s868_s20 }
  0xca   :  { %v771_v9 = vpop.f32.mrf.mxu0  ;;  %v777_v15 = vpop.f32.mrf.mxu1 }
  0xcc   :  { %v98_v10 = vpop.f32.mrf.mxu0  ;;  %v162_v16 = vpop.f32.mrf.mxu1 }
  0xcd   :  { %v480_v16 = vld [vmem:[%s1122_s9 + $0x8] sm:$0xff] }
  0xce   :  { %v772_v11 = vpop.f32.mrf.mxu0  ;;  %v778_v17 = vpop.f32.mrf.mxu1 }
 0x13b   :  { %v103_v12 = vpop.permute.xlu0 %102 }
 0x13c   :  { %v104_v13 = vsel %vm101_vm3, %v103_v12, %v95_v8 }
 0x13d   :  { %105 = vrot.lane.b32.xlu0 %v104_v13, %s868_s20  ;;  %v479_v13 = vld [vmem:[%s1122_s9] sm:$0xff] }
 0x1af   :  { %v106_v18 = vpop.permute.xlu0 %105 }
 0x1b0   :  { %v107_v19 = vsel %vm101_vm3, %v106_v18, %v95_v8 }
 0x1b1   :  { %116 = vrot.lane.b32.xlu1 %v107_v19, %s869_s2 }
 0x223   :  { %v117_v27 = vpop.permute.xlu1 %116 }
 0x224   :  { %v119_v28 = vsel %vm114_vm5, %v117_v27, 0.0 }
 0x225   :  { %v165_v29 = vadd.f32 %v159_v14, %v119_v28  ;;  %v409_v28 = vsel %vm408_vm8, 1, %v867_v7 }
 0x227   :  { %v172_v30 = vadd.f32 %v170_v25, %v165_v29  ;;  %v1064_v29 = vrot.slane %v409_v28, %v112_v23 }
 0x229   :  { %v173_v31 = vmax.f32 %v172_v30, 0.0  ;;  %vm414_vm9 = vcmp.eq.s32.totalorder %v1064_v29, 1 }
 0x22b   :  { %v174_v32 = vpack.c.bf16 %v173_v31, %v173_v31 }
 0x22d   :  { %v182_v33 = vsel %vm180_vm6, %v174_v32, 0 }
 0x22e   :  { %780 = vmatpush3.bf16.msra.mxu0 %v182_v33  ;;  %786 = vmatpush3.bf16.msra.mxu1 %v182_v33 }
 0x22f   :  { %791 = vmatprep.subr.bf16.mxu0 %v865_v1  ;;  %797 = vmatprep.subr.bf16.mxu1 %v865_v1 }
 0x231   :  { %782 = vmatmul.mubr.msk.bf16.vlgmr.msra.gmra.mxu0 %vm176_vm7, %v175_v34  ;;  %788 = vmatmul.mubr.msk.bf16.vlgmr.msra.gmra.mxu1 %vm176_vm7, %v730_v35 }
 0x232   :  { %792 = vmatpush3.bf16.msra.mxu0 %v59_v4  ;;  %793 = vmatprep.mubr.msk.bf16.mxu0 %vm866_vm1, %v865_v1  ;;  %v838_v4 = vld [vmem:[%s1121_s8] sm:$0xff]  }
 0x233   :  { %803 = vmatprep.subr.bf16.mxu0 %v865_v1  ;;  %799 = vmatprep.mubr.msk.bf16.mxu1 %vm866_vm1, %v865_v1 }
 0x239   :  { %794 = vmatmul.mubr.msk.bf16.vlgmr.msra.gmra.mxu0 %vm53_vm2, %v289_v36 }
 0x23a   :  { %805 = vmatprep.mubr.msk.bf16.mxu0 %vm866_vm1, %v865_v1 }
 0x2f1   :  { %v218_v37 = vpop.f32.mrf.mxu0  ;;  %v274_v44 = vpop.f32.mrf.mxu1 }
 0x2f2   :  { %224 = vrot.lane.b32.xlu0 %v218_v37, %s868_s20 }
 0x2f3   :  { %v783_v38 = vpop.f32.mrf.mxu0  ;;  %v789_v45 = vpop.f32.mrf.mxu1 }
 0x2f5   :  { %v221_v40 = vpop.f32.mrf.mxu0  ;;  %v277_v46 = vpop.f32.mrf.mxu1 }
 0x2f6   :  { %284 = vperm.xlu0 %837, %v281_v39   ;;  %v840_v39 = vld [vmem:[%s1123_s10] sm:$0xff]   ;;  %v841_v40 = vld [vmem:[%s1123_s10 + $0x8] sm:$0xff]  }
 0x2f7   :  { %v784_v41 = vpop.f32.mrf.mxu0  ;;  %v790_v48 = vpop.f32.mrf.mxu1 }
 0x2f8   :  { %v842_v41 = vld [vmem:[%s1125_s12] sm:$0xff]  }
 0x2f9   :  { %v333_v47 = vpop.f32.mrf.mxu0 }
 0x2fb   :  { %v795_v49 = vpop.f32.mrf.mxu0 }
 0x2fd   :  { %v336_v50 = vpop.f32.mrf.mxu0 }
 0x2fe   :  { %v625_v50 = vld [vmem:[%s1124_s11 + $0x8] sm:$0xff] }
 0x2ff   :  { %v796_v52 = vpop.f32.mrf.mxu0 }
 0x364   :  { %v225_v42 = vpop.permute.xlu0 %224 }
 0x365   :  { %v226_v43 = vsel %vm101_vm3, %v225_v42, %v218_v37 }
 0x366   :  { %227 = vrot.lane.b32.xlu1 %v226_v43, %s868_s20 }
 0x371   :  { %v285_v58 = vpop.permute.xlu0 %284 }
 0x3d8   :  { %v228_v51 = vpop.permute.xlu1 %227 }
 0x3d9   :  { %v229_v53 = vsel %vm101_vm3, %v228_v51, %v218_v37 }
 0x3da   :  { %231 = vrot.lane.b32.xlu1 %v229_v53, %s869_s2 }
 0x3de   :  { %293 = vperm.xlu1 %836, %v290_v54  }
 0x44c   :  { %v232_v55 = vpop.permute.xlu1 %231 }
 0x44d   :  { %v234_v56 = vsel %vm114_vm5, %v232_v55, 0.0 }
 0x44e   :  { %v280_v57 = vadd.f32 %v274_v44, %v234_v56 }
 0x450   :  { %v287_v59 = vadd.f32 %v285_v58, %v280_v57 }
 0x452   :  { %v288_v61 = vmax.f32 %v287_v59, 0.0 }
 0x459   :  { %v294_v60 = vpop.permute.xlu1 %293 }
 0x45a   :  { %v334_v62 = vadd.f32 %v333_v47, %v294_v60  ;;  %v624_v47 = vld [vmem:[%s1124_s11] sm:$0xff] }
 0x45c   :  { %v339_v63 = vadd.f32 %v334_v62, %v288_v61  ;;  %v642_v61 = vld [vmem:[%s1126_s13] sm:$0xff] }
 0x45e   :  { %v340_v0 = vmax.f32 %v339_v63, 0.0 }
 0x460   :  { %v341_v2 = vpack.c.bf16 %v340_v0, %v340_v0  ;;  %v643_v0 = vld [vmem:[%s1126_s13 + $0x8] sm:$0xff]  ;;  %s871_s13 = smov [#allocation2]  }
 0x461   :  { %s715_s25 = sshll.u32 %s871_s13, 4  ;;  %s716_s25 = int_to_ptr.vmem [resolvable:$true] %s715_s25 }
 0x462   :  { %v353_v3 = vsel %vm180_vm6, %v341_v2, 0  ;;  %s843_s26 = scalar_lea.vmem %s716_s25, 256  ;;  %p848_p1 = scmp.lt.s32.totalorder %s716_s25, %s716_s25 }
 0x463   :  { %798 = vmatpush3.bf16.msra.mxu1 %v353_v3  ;;  %804 = vmatpush3.bf16.msra.mxu0 %v353_v3  ;;  %p844_p0 = scmp.ne.s32.totalorder %s716_s25, %s843_s26  ;;  %p849_p2 = scmp.lt.s32.totalorder %s843_s26, %s843_s26 }
 0x464   :  { %809 = vmatprep.subr.bf16.mxu1 %v865_v1  ;;  %815 = vmatprep.subr.bf16.mxu0 %v865_v1 }
 0x465   :  { %p850_p3 = por %p849_p2, %p848_p1 }
 0x466   :  { %800 = vmatmul.mubr.msk.bf16.vlgmr.msra.gmra.mxu1 %vm176_vm7, %v838_v4  ;;  %806 = vmatmul.mubr.msk.bf16.vlgmr.msra.gmra.mxu0 %vm176_vm7, %v839_v5 }
 0x467   :  { %811 = vmatprep.mubr.msk.bf16.mxu1 %vm866_vm1, %v865_v1  ;;  %817 = vmatprep.mubr.msk.bf16.mxu0 %vm866_vm1, %v865_v1  ;;  %p851_p4 = pnand %p850_p3, %p844_p0 }
 0x526   :  { %v389_v6 = vpop.f32.mrf.mxu1  ;;  %v470_v17 = vpop.f32.mrf.mxu0 }
 0x527   :  { %396 = vrot.lane.b32.xlu0 %v389_v6, %s868_s20 }
 0x528   :  { %v801_v8 = vpop.f32.mrf.mxu1  ;;  %v807_v18 = vpop.f32.mrf.mxu0 }
 0x52a   :  { %v392_v9 = vpop.f32.mrf.mxu1  ;;  %v473_v19 = vpop.f32.mrf.mxu0 }
 0x52b   :  { %399 = vrot.lane.b32.xlu1 %v392_v9, %s868_s20 }
 0x52c   :  { %v802_v10 = vpop.f32.mrf.mxu1  ;;  %v808_v20 = vpop.f32.mrf.mxu0 }
 0x599   :  { %v397_v11 = vpop.permute.xlu0 %396 }
 0x59a   :  { %v398_v12 = vsel %vm101_vm3, %v397_v11, %v389_v6 }
 0x59b   :  { %402 = vrot.lane.b32.xlu0 %v398_v12, %s868_s20 }
 0x59d   :  { %v400_v14 = vpop.permute.xlu1 %399 }
 0x59e   :  { %v401_v15 = vsel %vm101_vm3, %v400_v14, %v392_v9 }
 0x59f   :  { %483 = vperm.xlu0 %837, %v479_v13   ;;  %404 = vrot.lane.b32.xlu1 %v401_v15, %s868_s20 }
 0x5a3   :  { %488 = vperm.xlu1 %836, %v480_v16  }
 0x60d   :  { %v403_v24 = vpop.permute.xlu0 %402 }
 0x60e   :  { %v406_v25 = vsel %vm101_vm3, %v403_v24, %v389_v6 }
 0x60f   :  { %417 = vrot.lane.b32.xlu0 %v406_v25, %s870_s17 }
 0x611   :  { %v405_v26 = vpop.permute.xlu1 %404 }
 0x612   :  { %v407_v27 = vsel %vm101_vm3, %v405_v26, %v392_v9 }
 0x613   :  { %419 = vrot.lane.b32.xlu1 %v407_v27, %s870_s17 }
 0x61a   :  { %v484_v30 = vpop.permute.xlu0 %483 }
 0x61e   :  { %v489_v31 = vpop.permute.xlu1 %488 }
 0x681   :  { %v418_v32 = vpop.permute.xlu0 %417 }
 0x682   :  { %v423_v33 = vsel %vm414_vm9, %v418_v32, 0.0 }
 0x683   :  { %v477_v34 = vadd.f32 %v470_v17, %v423_v33 }
 0x685   :  { %v420_v35 = vpop.permute.xlu1 %419  ;;  %v491_v21 = vadd.f32 %v484_v30, %v477_v34 }
 0x686   :  { %v424_v36 = vsel %vm414_vm9, %v420_v35, 0.0 }
 0x687   :  { %v478_v37 = vadd.f32 %v473_v19, %v424_v36  ;;  %v493_v38 = vmax.f32 %v491_v21, 0.0 }
 0x689   :  { %v492_v7 = vadd.f32 %v489_v31, %v478_v37 }
 0x68b   :  { %v494_v22 = vmax.f32 %v492_v7, 0.0 }
 0x68d   :  { %v495_v23 = vpack.c.bf16 %v494_v22, %v493_v38 }
 0x68f   :  { %810 = vmatpush3.bf16.msra.mxu1 %v495_v23  ;;  %816 = vmatpush3.bf16.msra.mxu0 %v495_v23 }
 0x690   :  { %821 = vmatprep.subr.bf16.mxu1 %v865_v1 }
 0x692   :  { %812 = vmatmul.mubr.msk.bf16.vlgmr.msra.gmra.mxu1 %vm503_vm10, %v840_v39  ;;  %818 = vmatmul.mubr.msk.bf16.vlgmr.msra.gmra.mxu0 %vm503_vm10, %v841_v40 }
 0x693   :  { %822 = vmatpush3.bf16.msra.mxu1 %v353_v3  ;;  %823 = vmatprep.mubr.msk.bf16.mxu1 %vm866_vm1, %v865_v1 }
 0x69a   :  { %824 = vmatmul.mubr.msk.bf16.vlgmr.msra.gmra.mxu1 %vm176_vm7, %v842_v41 }
 0x752   :  { %v541_v42 = vpop.f32.mrf.mxu1  ;;  %v615_v51 = vpop.f32.mrf.mxu0 }
 0x753   :  { %548 = vrot.lane.b32.xlu0 %v541_v42, %s868_s20 }
 0x754   :  { %v813_v43 = vpop.f32.mrf.mxu1  ;;  %v819_v52 = vpop.f32.mrf.mxu0 }
 0x756   :  { %v544_v44 = vpop.f32.mrf.mxu1  ;;  %v618_v53 = vpop.f32.mrf.mxu0 }
 0x757   :  { %551 = vrot.lane.b32.xlu1 %v544_v44, %s868_s20 }
 0x758   :  { %v814_v45 = vpop.f32.mrf.mxu1  ;;  %v820_v55 = vpop.f32.mrf.mxu0 }
 0x75a   :  { %v696_v54 = vpop.f32.mrf.mxu1 }
 0x75c   :  { %v825_v56 = vpop.f32.mrf.mxu1 }
 0x75e   :  { %v699_v57 = vpop.f32.mrf.mxu1 }
 0x760   :  { %v826_v60 = vpop.f32.mrf.mxu1 }
 0x7c5   :  { %v549_v1 = vpop.permute.xlu0 %548 }
 0x7c6   :  { %v550_v46 = vsel %vm101_vm3, %v549_v1, %v541_v42 }
 0x7c7   :  { %554 = vrot.lane.b32.xlu0 %v550_v46, %s868_s20 }
 0x7c9   :  { %v552_v48 = vpop.permute.xlu1 %551 }
 0x7ca   :  { %v553_v49 = vsel %vm101_vm3, %v552_v48, %v544_v44 }
 0x7cb   :  { %628 = vperm.xlu0 %837, %v624_v47   ;;  %556 = vrot.lane.b32.xlu1 %v553_v49, %s868_s20 }
 0x7cf   :  { %633 = vperm.xlu1 %836, %v625_v50  }
 0x839   :  { %v555_v58 = vpop.permute.xlu0 %554 }
 0x83a   :  { %v558_v59 = vsel %vm101_vm3, %v555_v58, %v541_v42 }
 0x83b   :  { %562 = vrot.lane.b32.xlu0 %v558_v59, %s870_s17 }
 0x83d   :  { %v557_v62 = vpop.permute.xlu1 %556 }
 0x83e   :  { %v559_v63 = vsel %vm101_vm3, %v557_v62, %v544_v44 }
 0x83f   :  { %646 = vperm.xlu0 %837, %v642_v61   ;;  %564 = vrot.lane.b32.xlu1 %v559_v63, %s870_s17 }
 0x843   :  { %651 = vperm.xlu1 %836, %v643_v0  }
 0x846   :  { %v629_v2 = vpop.permute.xlu0 %628 }
 0x84a   :  { %v634_v3 = vpop.permute.xlu1 %633 }
 0x8ad   :  { %v563_v4 = vpop.permute.xlu0 %562 }
 0x8ae   :  { %v568_v5 = vsel %vm414_vm9, %v563_v4, 0.0 }
 0x8af   :  { %v622_v8 = vadd.f32 %v615_v51, %v568_v5 }
 0x8b1   :  { %v565_v6 = vpop.permute.xlu1 %564  ;;  %v636_v10 = vadd.f32 %v629_v2, %v622_v8 }
 0x8b2   :  { %v569_v9 = vsel %vm414_vm9, %v565_v6, 0.0 }
 0x8b3   :  { %v623_v11 = vadd.f32 %v618_v53, %v569_v9  ;;  %v638_v13 = vmax.f32 %v636_v10, 0.0 }
 0x8b5   :  { %v637_v14 = vadd.f32 %v634_v3, %v623_v11 }
 0x8b7   :  { %v639_v18 = vmax.f32 %v637_v14, 0.0 }
 0x8ba   :  { %v647_v12 = vpop.permute.xlu0 %646 }
 0x8bb   :  { %v697_v15 = vadd.f32 %v696_v54, %v647_v12 }
 0x8bd   :  { %v703_v16 = vadd.f32 %v697_v15, %v638_v13 }
 0x8be   :  { %v652_v17 = vpop.permute.xlu1 %651 }
 0x8bf   :  { %v705_v19 = vmax.f32 %v703_v16, 0.0  ;;  %v700_v20 = vadd.f32 %v699_v57, %v652_v17 }
 0x8c1   :  { %708 = vst.msk [vmem:[#allocation2] sm:$0xff] %vm707_vm11, %v705_v19  ;;  %v704_v24 = vadd.f32 %v700_v20, %v639_v18 }
 0x8c3   :  { %v706_v25 = vmax.f32 %v704_v24, 0.0 }
 0x8c5   :  { %709 = vst.msk [vmem:[#allocation2 + $0x8] sm:$0xff] %vm707_vm11, %v706_v25 }
 0x8c6   :  { %854 = shalt.err (!%p851_p4)
}
 0x8c7   :  { %s872_s27 = smov 128   ;;  %s873_s4 = smov 8  }
 0x8c8   :  { %721 = dma.vmem_to_hbm [thread:$0]  %s716_s25, 256, %s1127_s14, [#allocation3], %s872_s27, %s872_s27, %s873_s4  }
 0x8c9   :  { %863 = dma.done.wait [#allocation3], 256  }
 0x8ca   :  { %864 = vsyncadd [#allocation3], 4294967040 }
 0x8cb   :  { %725 = vsyncpa [#allocation3], 1 }

</bundles_post_ra>
